<compile_context>
chip_gen: v7x
topology: tpu7x:2x2x1
jax: 0.10.0
libtpu: 0.0.40
codegen_flags: <defaults>
</compile_context>

<pallas_src>
import math
import functools

import jax
import jax.numpy as jnp
from jax.experimental import pallas as pl
from jax.experimental.pallas import tpu as pltpu


_INV_SQRT2 = 1.0 / math.sqrt(2.0)


def _round_up(x, m):
    return ((x + m - 1) // m) * m


# ---------------------------------------------------------------------------
# Kernels
# ---------------------------------------------------------------------------
def _mlp_kernel_resident(x_ref, w1_ref, b1_ref, w2_ref, b2_ref, o_ref):
    """Weights-resident path: grid = (token tiles,), full H in one step."""
    x_bf = x_ref[...].astype(jnp.bfloat16)          # in-kernel cast (VPU, free)
    h = jnp.dot(x_bf, w1_ref[...],
                preferred_element_type=jnp.float32) + b1_ref[...]
    # Exact (erf-based) GELU in f32, matching torch.nn.GELU() default.
    h = 0.5 * h * (1.0 + jax.lax.erf(h * _INV_SQRT2))
    out = jnp.dot(h.astype(jnp.bfloat16), w2_ref[...],
                  preferred_element_type=jnp.float32)
    o_ref[...] = (out + b2_ref[...]).astype(o_ref.dtype)


def _mlp_kernel_streamed(x_ref, w1_ref, b1_ref, w2_ref, b2_ref, o_ref, acc_ref):
    """Streamed path: grid = (token tiles, H tiles); H is a reduction axis
    accumulated into the f32 VMEM scratch acc_ref, output written once."""
    h_idx = pl.program_id(1)

    @pl.when(h_idx == 0)
    def _():
        acc_ref[...] = jnp.zeros_like(acc_ref)

    x_bf = x_ref[...].astype(jnp.bfloat16)
    h = jnp.dot(x_bf, w1_ref[...],
                preferred_element_type=jnp.float32) + b1_ref[...]
    h = 0.5 * h * (1.0 + jax.lax.erf(h * _INV_SQRT2))
    acc_ref[...] += jnp.dot(h.astype(jnp.bfloat16), w2_ref[...],
                            preferred_element_type=jnp.float32)

    @pl.when(h_idx == pl.num_programs(1) - 1)
    def _():
        o_ref[...] = (acc_ref[...] + b2_ref[...]).astype(o_ref.dtype)


# ---------------------------------------------------------------------------
# Tile selection / VMEM accounting
# ---------------------------------------------------------------------------
def _vmem_estimate(tm, e_p, th, x_bytes, out_bytes):
    x_t = tm * e_p * x_bytes        # x tile in its original dtype
    w1_t = e_p * th * 2             # bf16 W1 column block
    w2_t = th * e_p * 2             # bf16 W2 row block
    b1_t = th * 4
    b2_t = e_p * 4
    o_t = tm * e_p * out_bytes      # output tile
    acc = tm * e_p * 4              # resident f32 accumulator scratch
    gelu = tm * th * 6              # f32 GELU intermediate + its bf16 copy
    x_cast = tm * e_p * 2           # in-kernel bf16 copy of the x tile
    # double-buffered pipelined buffers + resident/intermediate buffers
    return 2 * (x_t + w1_t + w2_t + b1_t + b2_t + o_t) + acc + gelu + x_cast


def _vmem_budget():
    """Generation-aware VMEM working-set budget and hard cap."""
    cap = 64 * 1024 * 1024                      # conservative default (v7x/TC)
    try:
        info = pltpu.get_tpu_info()
        cap = int(getattr(info, "vmem_capacity_bytes", cap))
    except Exception:
        pass
    if cap >= 96 * 1024 * 1024:                 # v5e / v6e: 128 MiB physical
        budget = 100 * 1024 * 1024
    else:                                       # v7x: 64 MiB per TensorCore
        budget = int(0.75 * cap)                # ~48 MiB
    return budget, cap


def _select_tiles(n_tok, E, H, x_bytes, out_bytes, budget):
    """Pick (tm, th). Prefer weights-resident (th == padded H); otherwise
    stream weights with th floored at 256 (full MXU K-dim on v6e/v7x)."""
    E_p = _round_up(E, 128)
    H_full = _round_up(H, 128)

    def fits(tm, th):
        return _vmem_estimate(tm, E_p, th, x_bytes, out_bytes) <= budget

    # Token-tile candidates, largest first (multiples of 16 for bf16 packing).
    tm_max = _round_up(min(max(n_tok, 1), 1024), 16)
    if n_tok >= 1024:
        # Keep >= 2 parallel token tiles so multi-TensorCore chips (v7x)
        # can shard grid axis 0 across cores.
        tm_max = min(tm_max, _round_up((n_tok + 1) // 2, 16))
    tms = []
    t = tm_max
    while True:
        tms.append(t)
        if t <= 16:
            break
        t = max(16, _round_up(t // 2, 16))

    # 1) Weights resident: single H step, W1/W2 DMA'd from HBM exactly once.
    for tm in tms:
        if fits(tm, H_full):
            return tm, H_full
    # 2) Stream weights: shrink tm first, then th (floored at 256).
    th_floor = min(256, H_full)
    th = min(512, H_full)
    while True:
        for tm in tms:
            if fits(tm, th):
                return tm, th
        if th <= th_floor:
            break
        th = max(th_floor, _round_up(th // 2, 128))
    # 3) Last resort: smallest tiles.
    return 16, th_floor


# ---------------------------------------------------------------------------
# Wrapper
# ---------------------------------------------------------------------------
@functools.partial(jax.jit, static_argnames=("tm", "th", "vmem_limit"))
def _mlp_block_jit(x, w1, b1, w2, b2, *, tm, th, vmem_limit):
    orig_shape = x.shape
    orig_dtype = x.dtype
    E = x.shape[-1]
    H = w1.shape[-1]
    E_p = _round_up(E, 128)
    H_p = _round_up(H, th)

    x2d = x.reshape(-1, E)
    n_tok = x2d.shape[0]
    n_pad = _round_up(n_tok, tm)

    # Zero-padding is mathematically inert: GELU(0) = 0 and padded W2 rows /
    # bias columns are zero.  x stays in its original dtype (cast in-kernel).
    # TODO(synk): cache pre-padded / pre-cast weights across calls.
    x2d = jnp.pad(x2d, ((0, n_pad - n_tok), (0, E_p - E)))
    w1_bf = jnp.pad(w1, ((0, E_p - E), (0, H_p - H))).astype(jnp.bfloat16)
    w2_bf = jnp.pad(w2, ((0, H_p - H), (0, E_p - E))).astype(jnp.bfloat16)
    b1_f32 = jnp.pad(b1.reshape(1, -1).astype(jnp.float32),
                     ((0, 0), (0, H_p - H)))
    b2_f32 = jnp.pad(b2.reshape(1, -1).astype(jnp.float32),
                     ((0, 0), (0, E_p - E)))

    if H_p == th:
        # ---- weights-resident path: 1-D grid over token tiles ----
        out2d = pl.pallas_call(
            _mlp_kernel_resident,
            out_shape=jax.ShapeDtypeStruct((n_pad, E_p), orig_dtype),
            grid_spec=pltpu.PrefetchScalarGridSpec(
                num_scalar_prefetch=0,
                grid=(n_pad // tm,),
                in_specs=[
                    pl.BlockSpec((tm, E_p), lambda i: (i, 0)),   # x token tile
                    pl.BlockSpec((E_p, th), lambda i: (0, 0)),   # W1 (resident)
                    pl.BlockSpec((1, th), lambda i: (0, 0)),     # b1 (resident)
                    pl.BlockSpec((th, E_p), lambda i: (0, 0)),   # W2 (resident)
                    pl.BlockSpec((1, E_p), lambda i: (0, 0)),    # b2 (resident)
                ],
                out_specs=pl.BlockSpec((tm, E_p), lambda i: (i, 0)),
            ),
            compiler_params=pltpu.CompilerParams(
                dimension_semantics=("parallel",),
                vmem_limit_bytes=vmem_limit,
            ),
        )(x2d, w1_bf, b1_f32, w2_bf, b2_f32)
    else:
        # ---- streamed path: reduction (H) axis last, f32 accumulator ----
        out2d = pl.pallas_call(
            _mlp_kernel_streamed,
            out_shape=jax.ShapeDtypeStruct((n_pad, E_p), orig_dtype),
            grid_spec=pltpu.PrefetchScalarGridSpec(
                num_scalar_prefetch=0,
                grid=(n_pad // tm, H_p // th),
                in_specs=[
                    pl.BlockSpec((tm, E_p), lambda i, h: (i, 0)),   # x tile
                    pl.BlockSpec((E_p, th), lambda i, h: (0, h)),   # W1 cols
                    pl.BlockSpec((1, th), lambda i, h: (0, h)),     # b1 block
                    pl.BlockSpec((th, E_p), lambda i, h: (h, 0)),   # W2 rows
                    pl.BlockSpec((1, E_p), lambda i, h: (0, 0)),    # b2
                ],
                out_specs=pl.BlockSpec((tm, E_p), lambda i, h: (i, 0)),
                scratch_shapes=[pltpu.VMEM((tm, E_p), jnp.float32)],
            ),
            compiler_params=pltpu.CompilerParams(
                dimension_semantics=("parallel", "arbitrary"),
                vmem_limit_bytes=vmem_limit,
            ),
        )(x2d, w1_bf, b1_f32, w2_bf, b2_f32)

    return out2d[:n_tok, :E].reshape(orig_shape)


def mlp_block_pallas(x, w1, b1, w2, b2):
    """Fused MLPBlock forward: GELU(x @ W1 + b1) @ W2 + b2.

    x:  [..., E]
    w1: [E, H], b1: [H]   (PyTorch lin1.weight.T / lin1.bias)
    w2: [H, E], b2: [E]   (PyTorch lin2.weight.T / lin2.bias)
    """
    E = x.shape[-1]
    H = w1.shape[-1]
    n_tok = max(1, math.prod(x.shape[:-1]))
    x_bytes = jnp.dtype(x.dtype).itemsize
    out_bytes = x_bytes

    budget, cap = _vmem_budget()
    tm, th = _select_tiles(n_tok, E, H, x_bytes, out_bytes, budget)
    E_p = _round_up(E, 128)
    est = _vmem_estimate(tm, E_p, th, x_bytes, out_bytes)
    vmem_limit = min(cap, max(32 * 1024 * 1024, int(1.25 * est) + (4 << 20)))

    return _mlp_block_jit(x, w1, b1, w2, b2, tm=tm, th=th,
                          vmem_limit=vmem_limit)


def init_mlp_params(key, embedding_dim, mlp_dim, dtype=jnp.float32):
    """Deterministic PyTorch-Linear-style init (uniform(-1/sqrt(fan_in), ...))."""
    k1, k2, k3, k4 = jax.random.split(key, 4)
    bound1 = 1.0 / math.sqrt(embedding_dim)
    bound2 = 1.0 / math.sqrt(mlp_dim)
    # stored as [in, out] (transpose of torch's [out, in])
    w1 = jax.random.uniform(k1, (embedding_dim, mlp_dim), dtype, -bound1, bound1)
    b1 = jax.random.uniform(k2, (mlp_dim,), dtype, -bound1, bound1)
    w2 = jax.random.uniform(k3, (mlp_dim, embedding_dim), dtype, -bound2, bound2)
    b2 = jax.random.uniform(k4, (embedding_dim,), dtype, -bound2, bound2)
    return w1, b1, w2, b2


if __name__ == "__main__":
    # Small shapes consistent with the module: x = [batch, seq, embedding_dim]
    batch, seq, embedding_dim, mlp_dim = 2, 8, 32, 64

    key = jax.random.PRNGKey(0)
    kx, kp = jax.random.split(key)
    x = jax.random.normal(kx, (batch, seq, embedding_dim), jnp.float32)
    w1, b1, w2, b2 = init_mlp_params(kp, embedding_dim, mlp_dim)

    out = mlp_block_pallas(x, w1, b1, w2, b2)
    out = jax.block_until_ready(out)

    # Pure-JAX f32 reference (exact-erf GELU, like torch.nn.GELU()).
    # Kernel uses bf16 MXU operands -> allow bf16-level tolerance.
    h_ref = x @ w1 + b1
    h_ref = 0.5 * h_ref * (1.0 + jax.lax.erf(h_ref / math.sqrt(2.0)))
    out_ref = h_ref @ w2 + b2

    assert out.shape == x.shape
    assert jnp.allclose(out, out_ref, atol=5e-2, rtol=5e-2), (
        float(jnp.max(jnp.abs(out - out_ref))))

    print("KERNEL_OK")
</pallas_src>

<mosaic_0001>
module attributes {stable_mosaic.version = 11 : i64} {
  func.func @_mlp_kernel_resident(%arg0: i32, %arg1: memref<16x128xf32, #tpu.memory_space<vmem>>, %arg2: memref<128x128xbf16, #tpu.memory_space<vmem>>, %arg3: memref<1x128xf32, #tpu.memory_space<vmem>>, %arg4: memref<128x128xbf16, #tpu.memory_space<vmem>>, %arg5: memref<1x128xf32, #tpu.memory_space<vmem>>, %arg6: memref<16x128xf32, #tpu.memory_space<vmem>>) attributes {dimension_semantics = [#tpu.dimension_semantics<parallel>], iteration_bounds = array<i64: 1>, scalar_prefetch = 0 : i64, scratch_operands = 0 : i64, tpu.core_type = #tpu.core_type<tc>, window_params = [{transform_indices = @transform_0, window_bounds = array<i64: 16, 128>}, {pipeline_mode = #tpu.pipeline_mode<synchronous>, transform_indices = @transform_1, window_bounds = array<i64: 128, 128>}, {pipeline_mode = #tpu.pipeline_mode<synchronous>, transform_indices = @transform_2, window_bounds = array<i64: 1, 128>}, {pipeline_mode = #tpu.pipeline_mode<synchronous>, transform_indices = @transform_3, window_bounds = array<i64: 128, 128>}, {pipeline_mode = #tpu.pipeline_mode<synchronous>, transform_indices = @transform_4, window_bounds = array<i64: 1, 128>}, {transform_indices = @transform_5, window_bounds = array<i64: 16, 128>}]} {
    %c0 = arith.constant 0 : index
    %c0_0 = arith.constant 0 : index
    %0 = vector.load %arg1[%c0, %c0_0] : memref<16x128xf32, #tpu.memory_space<vmem>>, vector<16x128xf32>
    %1 = arith.truncf %0 : vector<16x128xf32> to vector<16x128xbf16>
    %c0_1 = arith.constant 0 : index
    %c0_2 = arith.constant 0 : index
    %2 = vector.load %arg2[%c0_1, %c0_2] : memref<128x128xbf16, #tpu.memory_space<vmem>>, vector<128x128xbf16>
    %cst = arith.constant dense<0.000000e+00> : vector<16x128xf32>
    %3 = tpu.matmul %1, %2, %cst {dimension_numbers = #tpu.dot_dimension_numbers<[1], [0], [0], [1], [0, 0, 1, 1], [], []>} : vector<16x128xbf16>, vector<128x128xbf16>, vector<16x128xf32> -> vector<16x128xf32>
    %c0_3 = arith.constant 0 : index
    %c0_4 = arith.constant 0 : index
    %4 = vector.load %arg3[%c0_3, %c0_4] : memref<1x128xf32, #tpu.memory_space<vmem>>, vector<1x128xf32>
    %5 = vector.broadcast %4 : vector<1x128xf32> to vector<16x128xf32>
    %6 = arith.addf %3, %5 : vector<16x128xf32>
    %cst_5 = arith.constant 5.000000e-01 : f32
    %7 = vector.broadcast %cst_5 : f32 to vector<16x128xf32>
    %8 = arith.mulf %7, %6 : vector<16x128xf32>
    %cst_6 = arith.constant 0.707106769 : f32
    %9 = vector.broadcast %cst_6 : f32 to vector<16x128xf32>
    %10 = arith.mulf %6, %9 : vector<16x128xf32>
    %11 = math.erf %10 : vector<16x128xf32>
    %cst_7 = arith.constant 1.000000e+00 : f32
    %12 = vector.broadcast %cst_7 : f32 to vector<16x128xf32>
    %13 = arith.addf %12, %11 : vector<16x128xf32>
    %14 = arith.mulf %8, %13 : vector<16x128xf32>
    %15 = arith.truncf %14 : vector<16x128xf32> to vector<16x128xbf16>
    %c0_8 = arith.constant 0 : index
    %c0_9 = arith.constant 0 : index
    %16 = vector.load %arg4[%c0_8, %c0_9] : memref<128x128xbf16, #tpu.memory_space<vmem>>, vector<128x128xbf16>
    %cst_10 = arith.constant dense<0.000000e+00> : vector<16x128xf32>
    %17 = tpu.matmul %15, %16, %cst_10 {dimension_numbers = #tpu.dot_dimension_numbers<[1], [0], [0], [1], [0, 0, 1, 1], [], []>} : vector<16x128xbf16>, vector<128x128xbf16>, vector<16x128xf32> -> vector<16x128xf32>
    %c0_11 = arith.constant 0 : index
    %c0_12 = arith.constant 0 : index
    %18 = vector.load %arg5[%c0_11, %c0_12] : memref<1x128xf32, #tpu.memory_space<vmem>>, vector<1x128xf32>
    %19 = vector.broadcast %18 : vector<1x128xf32> to vector<16x128xf32>
    %20 = arith.addf %17, %19 : vector<16x128xf32>
    %c0_13 = arith.constant 0 : index
    %c0_14 = arith.constant 0 : index
    %21 = vector.load %arg6[%c0_13, %c0_14] : memref<16x128xf32, #tpu.memory_space<vmem>>, vector<16x128xf32>
    tpu.vector_store %arg6[%c0_13, %c0_14], %20 {strides = array<i32>} : memref<16x128xf32, #tpu.memory_space<vmem>>, vector<16x128xf32>,
    return
  }
  func.func @transform_0(%arg0: i32) -> (i32, i32) {
    %c0_i32 = arith.constant 0 : i32
    %c0_i32_0 = arith.constant 0 : i32
    return %arg0, %c0_i32 : i32, i32
  }
  func.func @transform_1(%arg0: i32) -> (i32, i32) {
    %c0_i32 = arith.constant 0 : i32
    %c0_i32_0 = arith.constant 0 : i32
    %c0_i32_1 = arith.constant 0 : i32
    return %c0_i32, %c0_i32_0 : i32, i32
  }
  func.func @transform_2(%arg0: i32) -> (i32, i32) {
    %c0_i32 = arith.constant 0 : i32
    %c0_i32_0 = arith.constant 0 : i32
    %c0_i32_1 = arith.constant 0 : i32
    return %c0_i32, %c0_i32_0 : i32, i32
  }
  func.func @transform_3(%arg0: i32) -> (i32, i32) {
    %c0_i32 = arith.constant 0 : i32
    %c0_i32_0 = arith.constant 0 : i32
    %c0_i32_1 = arith.constant 0 : i32
    return %c0_i32, %c0_i32_0 : i32, i32
  }
  func.func @transform_4(%arg0: i32) -> (i32, i32) {
    %c0_i32 = arith.constant 0 : i32
    %c0_i32_0 = arith.constant 0 : i32
    %c0_i32_1 = arith.constant 0 : i32
    return %c0_i32, %c0_i32_0 : i32, i32
  }
  func.func @transform_5(%arg0: i32) -> (i32, i32) {
    %c0_i32 = arith.constant 0 : i32
    %c0_i32_0 = arith.constant 0 : i32
    return %arg0, %c0_i32 : i32, i32
  }
}

</mosaic_0001>

<bundles_post_ra>
// kernel: _mlp_block_jit.1
= control target key start
LH: loop header
LB: loop body
LE: loop exit
PB: predicated region body
PF: predicated region fallthrough
CT: control target
= control target key end

     0   :  { %v363_v0 = vmov 0.0   ;;  %vm364_vm0 = vmmov 0   ;;  %s461_s1 = inlined_call_operand.vmem [shape: bf16[128,128], index: 1, kind: input, shape index: {}]   ;;  %s462_s3 = inlined_call_operand.vmem [shape: bf16[128,128], index: 3, kind: input, shape index: {}]   ;;  %s463_s0 = inlined_call_operand.vmem [shape: f32[16,128], index: 0, kind: input, shape index: {}]   ;;  %s464_s2 = inlined_call_operand.vmem [shape: f32[1,128], index: 2, kind: input, shape index: {}]   ;;  %s465_s4 = inlined_call_operand.vmem [shape: f32[1,128], index: 4, kind: input, shape index: {}]   ;;  %s466_s5 = inlined_call_operand.vmem [shape: f32[16,128], index: 5, kind: output, shape index: {}]  }
   0x1   :  { %301 = vmatprep.subr.bf16.mxu0 %v363_v0  ;;  %v343_v1 = vld [vmem:[%s461_s1] sm:$0xff]   ;;  %317 = vmatprep.mubr.msk.bf16.mxu0 %vm364_vm0, %v363_v0  ;;  %v344_v2 = vld [vmem:[%s461_s1 + $0x8] sm:$0xff]   ;;  %v345_v3 = vld [vmem:[%s461_s1 + $0x10] sm:$0xff]  }
   0x2   :  { %321 = vmatprep.subr.bf16.mxu1 %v363_v0  ;;  %337 = vmatprep.mubr.msk.bf16.mxu1 %vm364_vm0, %v363_v0  ;;  %v351_v4 = vld [vmem:[%s462_s3] sm:$0xff]   ;;  %v346_v5 = vld [vmem:[%s461_s1 + $0x18] sm:$0xff]   ;;  %v352_v6 = vld [vmem:[%s462_s3 + $0x8] sm:$0xff]  }
   0x3   :  { %302 = vmatpush3.bf16.msra.mxu0 %v343_v1  ;;  %322 = vmatpush3.bf16.msra.mxu1 %v351_v4  ;;  %v347_v7 = vld [vmem:[%s461_s1 + $0x20] sm:$0xff]   ;;  %v348_v8 = vld [vmem:[%s461_s1 + $0x28] sm:$0xff]   ;;  %v349_v9 = vld [vmem:[%s461_s1 + $0x30] sm:$0xff]  }
   0x4   :  { %303 = vmatprep.subr.bf16.mxu0 %v363_v0  ;;  %323 = vmatprep.subr.bf16.mxu1 %v363_v0  ;;  %v350_v10 = vld [vmem:[%s461_s1 + $0x38] sm:$0xff]   ;;  %v21_v11 = vld [vmem:[%s463_s0] sm:$0xff]  ;;  %v22_v12 = vld [vmem:[%s463_s0 + $0x8] sm:$0xff] }
   0x5   :  { %v23_v13 = vpack.c.bf16 %v22_v12, %v21_v11  ;;  %v353_v14 = vld [vmem:[%s462_s3 + $0x10] sm:$0xff]   ;;  %v354_v15 = vld [vmem:[%s462_s3 + $0x18] sm:$0xff]   ;;  %v355_v16 = vld [vmem:[%s462_s3 + $0x20] sm:$0xff]  }
   0x6   :  { %v356_v17 = vld [vmem:[%s462_s3 + $0x28] sm:$0xff]   ;;  %v357_v18 = vld [vmem:[%s462_s3 + $0x30] sm:$0xff]   ;;  %v358_v19 = vld [vmem:[%s462_s3 + $0x38] sm:$0xff]  }
   0x7   :  { %304 = vmatpush3.bf16.msra.mxu0 %v344_v2  ;;  %324 = vmatpush3.bf16.msra.mxu1 %v352_v6  ;;  %v265_v20 = vld [vmem:[%s464_s2] ss:$0 sm:$0xff] }
   0x8   :  { %305 = vmatprep.subr.bf16.mxu0 %v363_v0  ;;  %325 = vmatprep.subr.bf16.mxu1 %v363_v0  ;;  %v274_v38 = vld [vmem:[%s465_s4] ss:$0 sm:$0xff] }
   0xb   :  { %306 = vmatpush3.bf16.msra.mxu0 %v345_v3  ;;  %326 = vmatpush3.bf16.msra.mxu1 %v353_v14 }
   0xc   :  { %307 = vmatprep.subr.bf16.mxu0 %v363_v0  ;;  %327 = vmatprep.subr.bf16.mxu1 %v363_v0 }
   0xf   :  { %308 = vmatpush3.bf16.msra.mxu0 %v346_v5  ;;  %328 = vmatpush3.bf16.msra.mxu1 %v354_v15 }
  0x10   :  { %309 = vmatprep.subr.bf16.mxu0 %v363_v0  ;;  %329 = vmatprep.subr.bf16.mxu1 %v363_v0 }
  0x13   :  { %310 = vmatpush3.bf16.msra.mxu0 %v347_v7  ;;  %330 = vmatpush3.bf16.msra.mxu1 %v355_v16 }
  0x14   :  { %311 = vmatprep.subr.bf16.mxu0 %v363_v0  ;;  %331 = vmatprep.subr.bf16.mxu1 %v363_v0 }
  0x17   :  { %312 = vmatpush3.bf16.msra.mxu0 %v348_v8  ;;  %332 = vmatpush3.bf16.msra.mxu1 %v356_v17 }
  0x18   :  { %313 = vmatprep.subr.bf16.mxu0 %v363_v0  ;;  %333 = vmatprep.subr.bf16.mxu1 %v363_v0 }
  0x1b   :  { %314 = vmatpush3.bf16.msra.mxu0 %v349_v9  ;;  %334 = vmatpush3.bf16.msra.mxu1 %v357_v18 }
  0x1c   :  { %315 = vmatprep.subr.bf16.mxu0 %v363_v0  ;;  %335 = vmatprep.subr.bf16.mxu1 %v363_v0 }
  0x1f   :  { %316 = vmatpush3.bf16.msra.mxu0 %v350_v10  ;;  %336 = vmatpush3.bf16.msra.mxu1 %v358_v19 }
  0x22   :  { %318 = vmatmul.mubr.bf16.vlgmr.msra.gmra.mrb[0].mxu0 %v23_v13 }
  0xf5   :  { %v129_v21 = vpop.f32.mrb[0].mxu0 }
  0xf6   :  { %v130_v22 = vadd.f32 %v265_v20, %v129_v21  ;;  %v319_v23 = vpop.f32.mrb[1].mxu0 }
  0xf7   :  { %v132_v24 = vpop.f32.mrb[2].mxu0 }
  0xf8   :  { %v138_v25 = vmul.f32 0.70710677, %v130_v22  ;;  %v133_v26 = vadd.f32 %v265_v20, %v132_v24  ;;  %v320_v27 = vpop.f32.mrb[3].mxu0  ;;  %v136_v32 = vmul.f32 0.5, %v130_v22 }
  0xfa   :  { %359 = verf.f32 %v138_v25  ;;  %v139_v28 = vmul.f32 0.70710677, %v133_v26  ;;  %v137_v33 = vmul.f32 0.5, %v133_v26 }
  0xfc   :  { %361 = verf.f32 %v139_v28 }
 0x104   :  { %v360_v29 = vpop.eup %359 }
 0x105   :  { %v142_v30 = vadd.f32 1.0, %v360_v29 }
 0x106   :  { %v362_v31 = vpop.eup %361 }
 0x107   :  { %v143_v34 = vadd.f32 1.0, %v362_v31  ;;  %v144_v35 = vmul.f32 %v142_v30, %v136_v32 }
 0x109   :  { %v145_v36 = vmul.f32 %v143_v34, %v137_v33 }
 0x10b   :  { %v146_v37 = vpack.c.bf16 %v145_v36, %v144_v35 }
 0x10d   :  { %338 = vmatmul.mubr.bf16.vlgmr.msra.gmra.mrb[0].mxu1 %v146_v37 }
 0x1e0   :  { %v252_v39 = vpop.f32.mrb[0].mxu1 }
 0x1e1   :  { %v253_v40 = vadd.f32 %v274_v38, %v252_v39  ;;  %v339_v41 = vpop.f32.mrb[1].mxu1 }
 0x1e2   :  { %v255_v42 = vpop.f32.mrb[2].mxu1 }
 0x1e3   :  { %259 = vst [vmem:[%s466_s5] sm:$0xff] %v253_v40  ;;  %v256_v43 = vadd.f32 %v274_v38, %v255_v42  ;;  %v340_v44 = vpop.f32.mrb[3].mxu1 }
 0x1e5   :  { %260 = vst [vmem:[%s466_s5 + $0x8] sm:$0xff] %v256_v43 }

</bundles_post_ra>
